<compile_context>
chip_gen: v6e
topology: v6e:2x2x1
jax: 0.10.0
libtpu: 0.0.40
codegen_flags: <defaults>
</compile_context>

<pallas_src>
import jax
import jax.numpy as jnp
from jax import lax
from jax.experimental import pallas as pl
from jax.experimental.pallas import tpu as pltpu

ALPHA = 3.0          # module default alpha=3
BETA = 3             # d ** 3, realized as d2 * sqrt(d2)
PERMUTE_LEN = 4      # module default permute_len=4
EPS = 1e-12
NEG_LARGE = -3.4e38  # plain Python float (no captured jnp constant)


def hard_dark_rank_kernel(student_ref, teacher_ref, loss_ref):
    student = student_ref[...]
    teacher = teacher_ref[...]
    n = student.shape[0]

    row_idx = lax.broadcasted_iota(jnp.int32, (n, n), 0)
    col_idx = lax.broadcasted_iota(jnp.int32, (n, n), 1)
    diag = row_idx == col_idx

    def score(e):
        # Gram matrix on the MXU; squared norms recovered from its diagonal.
        prod = lax.dot_general(e, e, (((1,), (1,)), ((), ())),
                               preferred_element_type=jnp.float32)   # e @ e.T
        diag_vals = jnp.where(diag, prod, 0.0)
        sq_row = jnp.sum(diag_vals, axis=1, keepdims=True)           # (n, 1)
        sq_col = jnp.sum(diag_vals, axis=0, keepdims=True)           # (1, n)
        d2 = jnp.maximum(sq_row + sq_col - 2.0 * prod, EPS)
        # -alpha * d**3 == -alpha * d2 * sqrt(d2). The diagonal is never
        # selected / never read, so no need to zero it.
        return (-ALPHA) * d2 * jnp.sqrt(d2)

    score_s = score(student)
    # Pre-mask the teacher diagonal so it can never win a pick. Off-diagonal
    # scores are strictly negative (> NEG_LARGE), so the PERMUTE_LEN picks
    # below equal entries 1..PERMUTE_LEN of a descending sort of score_t.
    masked_t = jnp.where(diag, NEG_LARGE, score(teacher))

    # Iterative row-wise argmax on teacher scores; the matching student score
    # is gathered with a one-hot masked sum (gather-free gather).
    # Assumes no exact f32 ties among off-diagonal teacher scores in a row
    # (probability ~0 for continuous embeddings).
    ordered = []
    for _ in range(PERMUTE_LEN):
        row_max = jnp.max(masked_t, axis=1, keepdims=True)            # (n, 1)
        onehot = masked_t == row_max                                  # (n, n)
        ordered.append(jnp.sum(jnp.where(onehot, score_s, 0.0),
                               axis=1, keepdims=True))                # (n, 1)
        masked_t = jnp.where(onehot, NEG_LARGE, masked_t)

    # log_prob = sum_i ( s_i - logsumexp(s_i .. s_{P-1}) ) via a backward
    # running logaddexp recurrence (O(P) exps instead of O(P^2)).
    lse = ordered[-1]                        # last term contributes 0
    log_prob = jnp.zeros_like(lse)
    for i in range(PERMUTE_LEN - 2, -1, -1):
        s_i = ordered[i]
        m = jnp.maximum(s_i, lse)
        lse = m + jnp.log(jnp.exp(s_i - m) + jnp.exp(lse - m))
        log_prob = log_prob + (s_i - lse)

    # loss = mean(-log_prob) over the batch rows
    loss_ref[...] = jnp.mean(-log_prob, axis=(0, 1), keepdims=True)


def hard_dark_rank_pairs(student, teacher):
    """Per-pair HardDarkRank losses for batched (B, N, D) inputs.

    One pallas_call, grid over the pair axis, marked "parallel" so v7x can
    spread pairs across both TensorCores; v5e/v6e are unaffected.
    """
    assert student.shape == teacher.shape and student.ndim == 3
    b, n, d = student.shape
    assert n >= PERMUTE_LEN + 1, "HardDarkRank needs at least permute_len+1 rows"
    out = pl.pallas_call(
        hard_dark_rank_kernel,
        out_shape=jax.ShapeDtypeStruct((b, 1, 1), jnp.float32),
        grid=(b,),
        in_specs=[
            pl.BlockSpec((None, n, d), lambda i: (i, 0, 0)),
            pl.BlockSpec((None, n, d), lambda i: (i, 0, 0)),
        ],
        out_specs=pl.BlockSpec((None, 1, 1), lambda i: (i, 0, 0)),
        compiler_params=pltpu.CompilerParams(
            dimension_semantics=("parallel",)),
    )(student, teacher)
    return out[:, 0, 0]


@jax.jit
def hard_dark_rank(student, teacher):
    """Scalar loss for one (N, D) student/teacher pair (the nn.Module forward)."""
    return hard_dark_rank_pairs(student[None], teacher[None])[0]


def reference(student, teacher):
    """Plain-JAX replica of the PyTorch forward, for a sanity check."""
    def pdist(e):
        n = e.shape[0]
        sq = jnp.sum(e * e, axis=1)
        d2 = jnp.maximum(sq[:, None] + sq[None, :] - 2.0 * (e @ e.T), EPS)
        d = jnp.sqrt(d2)
        return d * (1.0 - jnp.eye(n, dtype=d.dtype))

    score_t = -ALPHA * pdist(teacher) ** BETA
    score_s = -ALPHA * pdist(student) ** BETA
    idx = jnp.argsort(-score_t, axis=1)[:, 1:PERMUTE_LEN + 1]
    ordered = jnp.take_along_axis(score_s, idx, axis=1)
    lses = jnp.stack(
        [jax.nn.logsumexp(ordered[:, i:], axis=1) for i in range(PERMUTE_LEN)],
        axis=1)
    log_prob = jnp.sum(ordered - lses, axis=1)
    return jnp.mean(-log_prob)


if __name__ == "__main__":
    key = jax.random.PRNGKey(0)
    k_s, k_t = jax.random.split(key)
    N, D = 8, 32
    student = jax.random.normal(k_s, (N, D), dtype=jnp.float32)
    teacher = jax.random.normal(k_t, (N, D), dtype=jnp.float32)

    loss = jax.block_until_ready(hard_dark_rank(student, teacher))
    ref = jax.block_until_ready(reference(student, teacher))
    assert jnp.isfinite(loss), "kernel produced non-finite loss"
    assert jnp.allclose(loss, ref, rtol=1e-4, atol=1e-4), (loss, ref)

    # Batched path: several (student, teacher) pairs in one parallel-grid call.
    B = 3
    k_sb, k_tb = jax.random.split(jax.random.PRNGKey(1))
    sb = jax.random.normal(k_sb, (B, N, D), dtype=jnp.float32)
    tb = jax.random.normal(k_tb, (B, N, D), dtype=jnp.float32)
    losses = jax.block_until_ready(jax.jit(hard_dark_rank_pairs)(sb, tb))
    refs = jnp.stack([reference(sb[i], tb[i]) for i in range(B)])
    assert jnp.allclose(losses, refs, rtol=1e-4, atol=1e-4), (losses, refs)

    print("KERNEL_OK")
</pallas_src>

<mosaic_0001>
module attributes {stable_mosaic.version = 11 : i64} {
  func.func @hard_dark_rank_kernel(%arg0: i32, %arg1: memref<1x8x32xf32, #tpu.memory_space<vmem>>, %arg2: memref<1x8x32xf32, #tpu.memory_space<vmem>>, %arg3: memref<1x1x1xf32, #tpu.memory_space<vmem>>) attributes {dimension_semantics = [#tpu.dimension_semantics<parallel>], iteration_bounds = array<i64: 1>, scalar_prefetch = 0 : i64, scratch_operands = 0 : i64, tpu.core_type = #tpu.core_type<tc>, window_params = [{transform_indices = @transform_0, window_bounds = array<i64: 1, 8, 32>}, {transform_indices = @transform_1, window_bounds = array<i64: 1, 8, 32>}, {transform_indices = @transform_2, window_bounds = array<i64: 1, 1, 1>}]} {
    %c0 = arith.constant 0 : index
    %c0_0 = arith.constant 0 : index
    %c0_1 = arith.constant 0 : index
    %0 = vector.load %arg1[%c0, %c0_0, %c0_1] : memref<1x8x32xf32, #tpu.memory_space<vmem>>, vector<1x8x32xf32>
    %1 = vector.shape_cast %0 : vector<1x8x32xf32> to vector<8x32xf32>
    %c0_2 = arith.constant 0 : index
    %c0_3 = arith.constant 0 : index
    %c0_4 = arith.constant 0 : index
    %2 = vector.load %arg2[%c0_2, %c0_3, %c0_4] : memref<1x8x32xf32, #tpu.memory_space<vmem>>, vector<1x8x32xf32>
    %3 = vector.shape_cast %2 : vector<1x8x32xf32> to vector<8x32xf32>
    %4 = tpu.iota {dimensions = array<i32: 0>} : vector<8x8xi32>
    %5 = tpu.iota {dimensions = array<i32: 1>} : vector<8x8xi32>
    %6 = arith.cmpi eq, %4, %5 : vector<8x8xi32>
    %cst = arith.constant dense<0.000000e+00> : vector<8x8xf32>
    %7 = tpu.matmul %1, %1, %cst {dimension_numbers = #tpu.dot_dimension_numbers<[1], [1], [0], [0], [0, 0, 1, 0], [], []>} : vector<8x32xf32>, vector<8x32xf32>, vector<8x8xf32> -> vector<8x8xf32>
    %cst_5 = arith.constant 0.000000e+00 : f32
    %8 = vector.broadcast %cst_5 : f32 to vector<8x8xf32>
    %9 = arith.select %6, %7, %8 : vector<8x8xi1>, vector<8x8xf32>
    %cst_6 = arith.constant dense<0.000000e+00> : vector<8xf32>
    %10 = vector.multi_reduction <add>, %9, %cst_6 [1] : vector<8x8xf32> to vector<8xf32>
    %11 = vector.shape_cast %10 : vector<8xf32> to vector<8x1xf32>
    %cst_7 = arith.constant dense<0.000000e+00> : vector<8xf32>
    %12 = vector.multi_reduction <add>, %9, %cst_7 [0] : vector<8x8xf32> to vector<8xf32>
    %13 = vector.shape_cast %12 : vector<8xf32> to vector<1x8xf32>
    %14 = vector.broadcast %11 : vector<8x1xf32> to vector<8x8xf32>
    %15 = vector.broadcast %13 : vector<1x8xf32> to vector<8x8xf32>
    %16 = arith.addf %14, %15 : vector<8x8xf32>
    %cst_8 = arith.constant 2.000000e+00 : f32
    %17 = vector.broadcast %cst_8 : f32 to vector<8x8xf32>
    %18 = arith.mulf %17, %7 : vector<8x8xf32>
    %19 = arith.subf %16, %18 : vector<8x8xf32>
    %cst_9 = arith.constant 9.99999996E-13 : f32
    %20 = vector.broadcast %cst_9 : f32 to vector<8x8xf32>
    %21 = arith.maximumf %19, %20 : vector<8x8xf32>
    %cst_10 = arith.constant -3.000000e+00 : f32
    %22 = vector.broadcast %cst_10 : f32 to vector<8x8xf32>
    %23 = arith.mulf %22, %21 : vector<8x8xf32>
    %24 = math.sqrt %21 : vector<8x8xf32>
    %25 = arith.mulf %23, %24 : vector<8x8xf32>
    %cst_11 = arith.constant dense<0.000000e+00> : vector<8x8xf32>
    %26 = tpu.matmul %3, %3, %cst_11 {dimension_numbers = #tpu.dot_dimension_numbers<[1], [1], [0], [0], [0, 0, 1, 0], [], []>} : vector<8x32xf32>, vector<8x32xf32>, vector<8x8xf32> -> vector<8x8xf32>
    %cst_12 = arith.constant 0.000000e+00 : f32
    %27 = vector.broadcast %cst_12 : f32 to vector<8x8xf32>
    %28 = arith.select %6, %26, %27 : vector<8x8xi1>, vector<8x8xf32>
    %cst_13 = arith.constant dense<0.000000e+00> : vector<8xf32>
    %29 = vector.multi_reduction <add>, %28, %cst_13 [1] : vector<8x8xf32> to vector<8xf32>
    %30 = vector.shape_cast %29 : vector<8xf32> to vector<8x1xf32>
    %cst_14 = arith.constant dense<0.000000e+00> : vector<8xf32>
    %31 = vector.multi_reduction <add>, %28, %cst_14 [0] : vector<8x8xf32> to vector<8xf32>
    %32 = vector.shape_cast %31 : vector<8xf32> to vector<1x8xf32>
    %33 = vector.broadcast %30 : vector<8x1xf32> to vector<8x8xf32>
    %34 = vector.broadcast %32 : vector<1x8xf32> to vector<8x8xf32>
    %35 = arith.addf %33, %34 : vector<8x8xf32>
    %cst_15 = arith.constant 2.000000e+00 : f32
    %36 = vector.broadcast %cst_15 : f32 to vector<8x8xf32>
    %37 = arith.mulf %36, %26 : vector<8x8xf32>
    %38 = arith.subf %35, %37 : vector<8x8xf32>
    %cst_16 = arith.constant 9.99999996E-13 : f32
    %39 = vector.broadcast %cst_16 : f32 to vector<8x8xf32>
    %40 = arith.maximumf %38, %39 : vector<8x8xf32>
    %cst_17 = arith.constant -3.000000e+00 : f32
    %41 = vector.broadcast %cst_17 : f32 to vector<8x8xf32>
    %42 = arith.mulf %41, %40 : vector<8x8xf32>
    %43 = math.sqrt %40 : vector<8x8xf32>
    %44 = arith.mulf %42, %43 : vector<8x8xf32>
    %cst_18 = arith.constant -3.400000e+38 : f32
    %45 = vector.broadcast %cst_18 : f32 to vector<8x8xf32>
    %46 = arith.select %6, %45, %44 : vector<8x8xi1>, vector<8x8xf32>
    %cst_19 = arith.constant dense<0xFF800000> : vector<8xf32>
    %47 = vector.multi_reduction <maximumf>, %46, %cst_19 [1] : vector<8x8xf32> to vector<8xf32>
    %48 = vector.shape_cast %47 : vector<8xf32> to vector<8x1xf32>
    %49 = vector.broadcast %48 : vector<8x1xf32> to vector<8x8xf32>
    %50 = arith.cmpf oeq, %46, %49 : vector<8x8xf32>
    %cst_20 = arith.constant 0.000000e+00 : f32
    %51 = vector.broadcast %cst_20 : f32 to vector<8x8xf32>
    %52 = arith.select %50, %25, %51 : vector<8x8xi1>, vector<8x8xf32>
    %cst_21 = arith.constant dense<0.000000e+00> : vector<8xf32>
    %53 = vector.multi_reduction <add>, %52, %cst_21 [1] : vector<8x8xf32> to vector<8xf32>
    %54 = vector.shape_cast %53 : vector<8xf32> to vector<8x1xf32>
    %cst_22 = arith.constant -3.400000e+38 : f32
    %55 = vector.broadcast %cst_22 : f32 to vector<8x8xf32>
    %56 = arith.select %50, %55, %46 : vector<8x8xi1>, vector<8x8xf32>
    %cst_23 = arith.constant dense<0xFF800000> : vector<8xf32>
    %57 = vector.multi_reduction <maximumf>, %56, %cst_23 [1] : vector<8x8xf32> to vector<8xf32>
    %58 = vector.shape_cast %57 : vector<8xf32> to vector<8x1xf32>
    %59 = vector.broadcast %58 : vector<8x1xf32> to vector<8x8xf32>
    %60 = arith.cmpf oeq, %56, %59 : vector<8x8xf32>
    %cst_24 = arith.constant 0.000000e+00 : f32
    %61 = vector.broadcast %cst_24 : f32 to vector<8x8xf32>
    %62 = arith.select %60, %25, %61 : vector<8x8xi1>, vector<8x8xf32>
    %cst_25 = arith.constant dense<0.000000e+00> : vector<8xf32>
    %63 = vector.multi_reduction <add>, %62, %cst_25 [1] : vector<8x8xf32> to vector<8xf32>
    %64 = vector.shape_cast %63 : vector<8xf32> to vector<8x1xf32>
    %cst_26 = arith.constant -3.400000e+38 : f32
    %65 = vector.broadcast %cst_26 : f32 to vector<8x8xf32>
    %66 = arith.select %60, %65, %56 : vector<8x8xi1>, vector<8x8xf32>
    %cst_27 = arith.constant dense<0xFF800000> : vector<8xf32>
    %67 = vector.multi_reduction <maximumf>, %66, %cst_27 [1] : vector<8x8xf32> to vector<8xf32>
    %68 = vector.shape_cast %67 : vector<8xf32> to vector<8x1xf32>
    %69 = vector.broadcast %68 : vector<8x1xf32> to vector<8x8xf32>
    %70 = arith.cmpf oeq, %66, %69 : vector<8x8xf32>
    %cst_28 = arith.constant 0.000000e+00 : f32
    %71 = vector.broadcast %cst_28 : f32 to vector<8x8xf32>
    %72 = arith.select %70, %25, %71 : vector<8x8xi1>, vector<8x8xf32>
    %cst_29 = arith.constant dense<0.000000e+00> : vector<8xf32>
    %73 = vector.multi_reduction <add>, %72, %cst_29 [1] : vector<8x8xf32> to vector<8xf32>
    %74 = vector.shape_cast %73 : vector<8xf32> to vector<8x1xf32>
    %cst_30 = arith.constant -3.400000e+38 : f32
    %75 = vector.broadcast %cst_30 : f32 to vector<8x8xf32>
    %76 = arith.select %70, %75, %66 : vector<8x8xi1>, vector<8x8xf32>
    %cst_31 = arith.constant dense<0xFF800000> : vector<8xf32>
    %77 = vector.multi_reduction <maximumf>, %76, %cst_31 [1] : vector<8x8xf32> to vector<8xf32>
    %78 = vector.shape_cast %77 : vector<8xf32> to vector<8x1xf32>
    %79 = vector.broadcast %78 : vector<8x1xf32> to vector<8x8xf32>
    %80 = arith.cmpf oeq, %76, %79 : vector<8x8xf32>
    %cst_32 = arith.constant 0.000000e+00 : f32
    %81 = vector.broadcast %cst_32 : f32 to vector<8x8xf32>
    %82 = arith.select %80, %25, %81 : vector<8x8xi1>, vector<8x8xf32>
    %cst_33 = arith.constant dense<0.000000e+00> : vector<8xf32>
    %83 = vector.multi_reduction <add>, %82, %cst_33 [1] : vector<8x8xf32> to vector<8xf32>
    %84 = vector.shape_cast %83 : vector<8xf32> to vector<8x1xf32>
    %cst_34 = arith.constant 0.000000e+00 : f32
    %85 = vector.broadcast %cst_34 : f32 to vector<8x1xf32>
    %86 = arith.maximumf %74, %84 : vector<8x1xf32>
    %87 = arith.subf %74, %86 : vector<8x1xf32>
    %88 = math.exp %87 : vector<8x1xf32>
    %89 = arith.subf %84, %86 : vector<8x1xf32>
    %90 = math.exp %89 : vector<8x1xf32>
    %91 = arith.addf %88, %90 : vector<8x1xf32>
    %92 = math.log %91 : vector<8x1xf32>
    %93 = arith.addf %86, %92 : vector<8x1xf32>
    %94 = arith.subf %74, %93 : vector<8x1xf32>
    %95 = arith.addf %85, %94 : vector<8x1xf32>
    %96 = arith.maximumf %64, %93 : vector<8x1xf32>
    %97 = arith.subf %64, %96 : vector<8x1xf32>
    %98 = math.exp %97 : vector<8x1xf32>
    %99 = arith.subf %93, %96 : vector<8x1xf32>
    %100 = math.exp %99 : vector<8x1xf32>
    %101 = arith.addf %98, %100 : vector<8x1xf32>
    %102 = math.log %101 : vector<8x1xf32>
    %103 = arith.addf %96, %102 : vector<8x1xf32>
    %104 = arith.subf %64, %103 : vector<8x1xf32>
    %105 = arith.addf %95, %104 : vector<8x1xf32>
    %106 = arith.maximumf %54, %103 : vector<8x1xf32>
    %107 = arith.subf %54, %106 : vector<8x1xf32>
    %108 = math.exp %107 : vector<8x1xf32>
    %109 = arith.subf %103, %106 : vector<8x1xf32>
    %110 = math.exp %109 : vector<8x1xf32>
    %111 = arith.addf %108, %110 : vector<8x1xf32>
    %112 = math.log %111 : vector<8x1xf32>
    %113 = arith.addf %106, %112 : vector<8x1xf32>
    %114 = arith.subf %54, %113 : vector<8x1xf32>
    %115 = arith.addf %105, %114 : vector<8x1xf32>
    %cst_35 = arith.constant 0.000000e+00 : f32
    %116 = vector.broadcast %cst_35 : f32 to vector<8x1xf32>
    %117 = arith.subf %116, %115 : vector<8x1xf32>
    %118 = vector.shape_cast %117 : vector<8x1xf32> to vector<1x8x1xf32>
    %cst_36 = arith.constant dense<0.000000e+00> : vector<1xf32>
    %119 = vector.multi_reduction <add>, %118, %cst_36 [1, 2] : vector<1x8x1xf32> to vector<1xf32>
    %120 = vector.shape_cast %119 : vector<1xf32> to vector<1x1x1xf32>
    %121 = vector.extract %120[0, 0, 0] : f32 from vector<1x1x1xf32>
    %122 = vector.broadcast %121 : f32 to vector<1x1xf32>
    %cst_37 = arith.constant 8.000000e+00 : f32
    %123 = vector.broadcast %cst_37 : f32 to vector<1x1xf32>
    %124 = arith.divf %122, %123 : vector<1x1xf32>
    %c0_38 = arith.constant 0 : index
    %c0_39 = arith.constant 0 : index
    %c0_40 = arith.constant 0 : index
    %125 = vector.load %arg3[%c0_38, %c0_39, %c0_40] : memref<1x1x1xf32, #tpu.memory_space<vmem>>, vector<1x1x1xf32>
    %126 = vector.shape_cast %125 : vector<1x1x1xf32> to vector<1x1xf32>
    %127 = vector.shape_cast %124 : vector<1x1xf32> to vector<1x1x1xf32>
    tpu.vector_store %arg3[%c0_38, %c0_39, %c0_40], %127 {strides = array<i32>} : memref<1x1x1xf32, #tpu.memory_space<vmem>>, vector<1x1x1xf32>,
    return
  }
  func.func @transform_0(%arg0: i32) -> (i32, i32, i32) {
    %c0_i32 = arith.constant 0 : i32
    %c0_i32_0 = arith.constant 0 : i32
    %c0_i32_1 = arith.constant 0 : i32
    return %arg0, %c0_i32, %c0_i32_0 : i32, i32, i32
  }
  func.func @transform_1(%arg0: i32) -> (i32, i32, i32) {
    %c0_i32 = arith.constant 0 : i32
    %c0_i32_0 = arith.constant 0 : i32
    %c0_i32_1 = arith.constant 0 : i32
    return %arg0, %c0_i32, %c0_i32_0 : i32, i32, i32
  }
  func.func @transform_2(%arg0: i32) -> (i32, i32, i32) {
    %c0_i32 = arith.constant 0 : i32
    %c0_i32_0 = arith.constant 0 : i32
    %c0_i32_1 = arith.constant 0 : i32
    return %arg0, %c0_i32, %c0_i32_0 : i32, i32, i32
  }
}

</mosaic_0001>

<bundles_post_ra>
// kernel: hard_dark_rank.1
= control target key start
LH: loop header
LB: loop body
LE: loop exit
PB: predicated region body
PF: predicated region fallthrough
CT: control target
= control target key end

     0   :  { %7 = vsyncpa [#allocation3], 0  ;;  %s504_s0 = inlined_call_operand.hbm [shape: f32[1,8,32], index: 0, kind: input, shape index: {}]   ;;  %s505_s1 = inlined_call_operand.hbm [shape: f32[1,8,32], index: 1, kind: input, shape index: {}]   ;;  %s506_s2 = inlined_call_operand.hbm [shape: f32[1,1,1], index: 2, kind: output, shape index: {}]  }
   0x1   :  { %8 = vsyncpa [#allocation6], 0 }
   0x2   :  { %9 = vsyncpa [#allocation4], 0  ;;  %s458_s9 = smov [#allocation2]   ;;  %s459_s11 = smov [#allocation5]  }
   0x3   :  { %s16_s10 = sshll.u32 %s458_s9, 4  ;;  %s26_s12 = sshll.u32 %s459_s11, 4  ;;  %s17_s10 = int_to_ptr.vmem [resolvable:$true] %s16_s10  ;;  %s27_s12 = int_to_ptr.vmem [resolvable:$true] %s26_s12 }
   0x4   :  { %s400_s13 = scalar_lea.vmem %s17_s10, 128  ;;  %p405_p1 = scmp.lt.s32.totalorder %s17_s10, %s17_s10 }
   0x5   :  { %p401_p0 = scmp.ne.s32.totalorder %s17_s10, %s400_s13  ;;  %p406_p2 = scmp.lt.s32.totalorder %s400_s13, %s400_s13 }
   0x7   :  { %p407_p3 = por %p406_p2, %p405_p1 }
   0x9   :  { %p408_p4 = pnand %p407_p3, %p401_p0 }
   0xb   :  { %411 = shalt.err (!%p408_p4)
}
   0xc   :  { %19 = dma.hbm_to_vmem [thread:$0]  %s504_s0, 128, %s17_s10, [#allocation3]  }
   0xd   :  { %s420_s16 = scalar_lea.vmem %s27_s12, 128  ;;  %p425_p6 = scmp.lt.s32.totalorder %s27_s12, %s27_s12 }
   0xe   :  { %p421_p5 = scmp.ne.s32.totalorder %s27_s12, %s420_s16  ;;  %p426_p7 = scmp.lt.s32.totalorder %s420_s16, %s420_s16 }
  0x10   :  { %p427_p8 = por %p426_p7, %p425_p6 }
  0x12   :  { %p428_p9 = pnand %p427_p8, %p421_p5 }
  0x14   :  { %431 = shalt.err (!%p428_p9)
}
  0x15   :  { %29 = dma.hbm_to_vmem [thread:$0]  %s505_s1, 128, %s27_s12, [#allocation6]  }
  0x16   :  { %452 = dma.done.wait [#allocation3], 128  }
  0x17   :  { %453 = vsyncadd [#allocation3], 4294967168 }
  0x18   :  { %454 = dma.done.wait [#allocation6], 128  }
  0x19   :  { %455 = vsyncadd [#allocation6], 4294967168  ;;  %v460_v0 = vmov 0.0   ;;  %vm461_vm0 = vmmov 0   ;;  %vm43_vm1 = vcmask 261120   ;;  %v37_v1 = vld [vmem:[#allocation5] sm:$0xff]  ;;  %v38_v3 = vlaneseq }
  0x1a   :  { %358 = vmatprep.subr.mxu1 %v460_v0  ;;  %360 = vmatprep.mubr.msk.f32.mxu1 %vm461_vm0, %v460_v0  ;;  %v36_v2 = vld [vmem:[#allocation2] sm:$0xff]  ;;  %vm118_vm3 = vcmask 64512   ;;  %vm313_vm12 = vcmask 7168   ;;  %s462_s0 = smov [#allocation7]   ;;  %vm327_vm13 = vcmask 0  }
  0x1b   :  { %353 = vmatprep.subr.mxu0 %v460_v0  ;;  %355 = vmatprep.mubr.msk.f32.mxu0 %vm461_vm0, %v460_v0  ;;  %v39_v4 = vshrl.u32 %v38_v3, 7  ;;  %v41_v5 = vand.u32 127, %v38_v3  ;;  %s335_s1 = sshll.u32 %s462_s0, 4  ;;  %s336_s1 = int_to_ptr.vmem [resolvable:$true] %s335_s1 }
  0x1c   :  { %359 = vmatpush3.xpose.msk.msra.mxu1 %vm43_vm1, %v37_v1  ;;  %354 = vmatpush3.xpose.msk.msra.mxu0 %vm43_vm1, %v36_v2  ;;  %s432_s20 = scalar_lea.vmem %s336_s1, 16  ;;  %s436_s21 = scalar_lea.vmem %s336_s1, 32 }
  0x1d   :  { %vm42_vm2 = vcmp.eq.s32.totalorder %v39_v4, %v41_v5  ;;  %p433_p10 = scmp.ne.s32.totalorder %s336_s1, %s432_s20  ;;  %p437_p11 = scmp.lt.s32.totalorder %s336_s1, %s336_s1 }
  0x1e   :  { %p438_p12 = scmp.lt.s32.totalorder %s436_s21, %s432_s20 }
  0x1f   :  { %361 = vmatmul.mubr.msk.f32.vlgmr.msra.gmra.mxu1 %vm43_vm1, %v37_v1  ;;  %356 = vmatmul.mubr.msk.f32.vlgmr.msra.gmra.mxu0 %vm43_vm1, %v36_v2 }
  0x20   :  { %p439_p13 = por %p438_p12, %p437_p11 }
  0x22   :  { %p440_p0 = pnand %p439_p13, %p433_p10 }
  0xdf   :  { %v210_v6 = vpop.f32.mrf.mxu1  ;;  %v113_v10 = vpop.f32.mrf.mxu0 }
  0xe0   :  { %v214_v7 = vsel %vm42_vm2, %v210_v6, 0.0  ;;  %v225_v19 = vmul.f32 2.0, %v210_v6  ;;  %v117_v31 = vsel %vm42_vm2, %v113_v10, 0.0  ;;  %v129_v47 = vmul.f32 2.0, %v113_v10 }
  0xe1   :  { %v362_v8 = vpop.f32.mrf.mxu1  ;;  %v215_v9 = vsel %vm118_vm3, %v214_v7, 0.0  ;;  %v357_v11 = vpop.f32.mrf.mxu0  ;;  %v119_v33 = vsel %vm118_vm3, %v117_v31, 0.0 }
  0xe2   :  { %216 = vadd.xlane.f32.xlu0 %v215_v9  ;;  %v218_v12 = vrot.slane %v215_v9, 4  ;;  %v122_v40 = vrot.slane %v119_v33, 4 }
  0xe4   :  { %v219_v13 = vadd.f32 %v218_v12, %v215_v9  ;;  %v123_v41 = vadd.f32 %v122_v40, %v119_v33 }
  0xe6   :  { %v220_v14 = vrot.slane %v219_v13, 2  ;;  %v124_v42 = vrot.slane %v123_v41, 2 }
  0xe8   :  { %v221_v15 = vadd.f32 %v220_v14, %v219_v13  ;;  %v125_v43 = vadd.f32 %v124_v42, %v123_v41 }
  0xea   :  { %v222_v16 = vrot.slane %v221_v15, 1  ;;  %v126_v44 = vrot.slane %v125_v43, 1 }
  0xec   :  { %v223_v17 = vadd.f32 %v222_v16, %v221_v15  ;;  %v127_v45 = vadd.f32 %v126_v44, %v125_v43 }
 0x16b   :  { %v217_v18 = vpop.xlane.xlu0 %216 }
 0x16c   :  { %v224_v20 = vadd.f32 %v223_v17, %v217_v18 }
 0x16e   :  { %v226_v21 = vsub.f32 %v224_v20, %v225_v19 }
 0x170   :  { %v227_v22 = vmax.f32 %v226_v21, 1e-12 }
 0x172   :  { %370 = vrsqrt.f32 %v227_v22  ;;  %vm231_vm4 = vcmp.eq.f32.partialorder %v227_v22, inf  ;;  %v234_v25 = vand.u32 2147483648, %v227_v22  ;;  %v228_v26 = vmul.f32 -3.0, %v227_v22 }
 0x173   :  { %vm233_vm5 = vcmp.eq.f32.partialorder %v227_v22, 0.0 }
 0x17f   :  { %v371_v23 = vpop.eup %370 }
 0x180   :  { %v230_v24 = vmul.f32 %v371_v23, %v227_v22 }
 0x182   :  { %v232_v27 = vsel %vm231_vm4, %v227_v22, %v230_v24 }
 0x183   :  { %v235_v28 = vsel %vm233_vm5, %v234_v25, %v232_v27 }
 0x184   :  { %v236_v29 = vmul.f32 %v235_v28, %v228_v26 }
 0x186   :  { %v237_v30 = vsel %vm42_vm2, -3.4e+38, %v236_v29 }
 0x187   :  { %v238_v32 = vsel %vm118_vm3, %v237_v30, -inf }
 0x188   :  { %239 = vmax.xlane.f32.xlu0 %v238_v32 }
 0x18c   :  { %120 = vadd.xlane.f32.xlu0 %v119_v33 }
 0x211   :  { %v240_v34 = vpop.xlane.xlu0 %239 }
 0x212   :  { %vm241_vm6 = vcmp.eq.f32.partialorder %v237_v30, %v240_v34 }
 0x213   :  { %v246_v35 = vsel %vm241_vm6, -3.4e+38, %v237_v30 }
 0x214   :  { %v247_v36 = vsel %vm118_vm3, %v246_v35, -inf }
 0x215   :  { %248 = vmax.xlane.f32.xlu1 %v247_v36  ;;  %v121_v46 = vpop.xlane.xlu0 %120 }
 0x216   :  { %v128_v48 = vadd.f32 %v127_v45, %v121_v46 }
 0x218   :  { %v130_v49 = vsub.f32 %v128_v48, %v129_v47 }
 0x21a   :  { %v131_v50 = vmax.f32 %v130_v49, 1e-12 }
 0x21c   :  { %372 = vrsqrt.f32 %v131_v50  ;;  %vm135_vm8 = vcmp.eq.f32.partialorder %v131_v50, inf  ;;  %v138_v53 = vand.u32 2147483648, %v131_v50  ;;  %vm137_vm9 = vcmp.eq.f32.partialorder %v131_v50, 0.0 }
 0x21d   :  { %v132_v55 = vmul.f32 -3.0, %v131_v50 }
 0x229   :  { %v373_v51 = vpop.eup %372 }
 0x22a   :  { %v134_v52 = vmul.f32 %v373_v51, %v131_v50 }
 0x22c   :  { %v136_v54 = vsel %vm135_vm8, %v131_v50, %v134_v52 }
 0x22d   :  { %v139_v56 = vsel %vm137_vm9, %v138_v53, %v136_v54 }
 0x22e   :  { %v140_v58 = vmul.f32 %v139_v56, %v132_v55 }
 0x230   :  { %v242_v4 = vsel %vm241_vm6, %v140_v58, 0.0 }
 0x231   :  { %v243_v5 = vsel %vm118_vm3, %v242_v4, 0.0 }
 0x29e   :  { %v249_v37 = vpop.xlane.xlu1 %248 }
 0x29f   :  { %vm250_vm7 = vcmp.eq.f32.partialorder %v246_v35, %v249_v37 }
 0x2a0   :  { %v255_v38 = vsel %vm250_vm7, -3.4e+38, %v246_v35  ;;  %v251_v63 = vsel %vm250_vm7, %v140_v58, 0.0 }
 0x2a1   :  { %v256_v39 = vsel %vm118_vm3, %v255_v38, -inf  ;;  %v252_v0 = vsel %vm118_vm3, %v251_v63, 0.0 }
 0x2a2   :  { %257 = vmax.xlane.f32.xlu1 %v256_v39 }
 0x32b   :  { %v258_v57 = vpop.xlane.xlu1 %257 }
 0x32c   :  { %vm259_vm10 = vcmp.eq.f32.partialorder %v255_v38, %v258_v57 }
 0x32d   :  { %v264_v59 = vsel %vm259_vm10, -3.4e+38, %v255_v38  ;;  %v260_v60 = vsel %vm259_vm10, %v140_v58, 0.0 }
 0x32e   :  { %v265_v61 = vsel %vm118_vm3, %v264_v59, -inf  ;;  %v261_v62 = vsel %vm118_vm3, %v260_v60, 0.0 }
 0x32f   :  { %266 = vmax.xlane.f32.xlu1 %v265_v61  ;;  %262 = vadd.xlane.f32.xlu0 %v261_v62 }
 0x333   :  { %253 = vadd.xlane.f32.xlu0 %v252_v0 }
 0x3b8   :  { %v267_v1 = vpop.xlane.xlu1 %266  ;;  %v263_v6 = vpop.xlane.xlu0 %262 }
 0x3b9   :  { %vm268_vm11 = vcmp.eq.f32.partialorder %v264_v59, %v267_v1 }
 0x3ba   :  { %v269_v2 = vsel %vm268_vm11, %v140_v58, 0.0 }
 0x3bb   :  { %v270_v3 = vsel %vm118_vm3, %v269_v2, 0.0 }
 0x3bc   :  { %271 = vadd.xlane.f32.xlu1 %v270_v3  ;;  %v254_v19 = vpop.xlane.xlu0 %253 }
 0x3c0   :  { %244 = vadd.xlane.f32.xlu1 %v243_v5 }
 0x445   :  { %v272_v7 = vpop.xlane.xlu1 %271 }
 0x446   :  { %v273_v8 = vmax.f32 %v263_v6, %v272_v7 }
 0x448   :  { %v274_v9 = vsub.f32 %v263_v6, %v273_v8  ;;  %v277_v10 = vsub.f32 %v272_v7, %v273_v8 }
 0x449   :  { %v245_v31 = vpop.xlane.xlu1 %244 }
 0x44a   :  { %v275_v11 = vmul.f32 1.442695, %v274_v9  ;;  %v278_v12 = vmul.f32 1.442695, %v277_v10 }
 0x44c   :  { %374 = vpow2.f32 %v275_v11 }
 0x44d   :  { %376 = vpow2.f32 %v278_v12 }
 0x459   :  { %v375_v13 = vpop.eup %374 }
 0x45a   :  { %v377_v14 = vpop.eup %376 }
 0x45b   :  { %v280_v15 = vadd.f32 %v377_v14, %v375_v13 }
 0x45d   :  { %378 = vlog2.f32 %v280_v15 }
 0x46a   :  { %v379_v16 = vpop.eup %378 }
 0x46b   :  { %v282_v17 = vmul.f32 0.6931472, %v379_v16 }
 0x46d   :  { %v283_v18 = vadd.f32 %v282_v17, %v273_v8 }
 0x46f   :  { %v286_v20 = vmax.f32 %v254_v19, %v283_v18  ;;  %v284_v44 = vsub.f32 %v263_v6, %v283_v18 }
 0x471   :  { %v287_v21 = vsub.f32 %v254_v19, %v286_v20  ;;  %v290_v22 = vsub.f32 %v283_v18, %v286_v20 }
 0x473   :  { %v288_v23 = vmul.f32 1.442695, %v287_v21  ;;  %v291_v24 = vmul.f32 1.442695, %v290_v22 }
 0x475   :  { %380 = vpow2.f32 %v288_v23 }
 0x476   :  { %382 = vpow2.f32 %v291_v24 }
 0x482   :  { %v381_v25 = vpop.eup %380 }
 0x483   :  { %v383_v26 = vpop.eup %382 }
 0x484   :  { %v293_v27 = vadd.f32 %v383_v26, %v381_v25 }
 0x486   :  { %384 = vlog2.f32 %v293_v27 }
 0x493   :  { %v385_v28 = vpop.eup %384 }
 0x494   :  { %v295_v29 = vmul.f32 0.6931472, %v385_v28 }
 0x496   :  { %v296_v30 = vadd.f32 %v295_v29, %v286_v20 }
 0x498   :  { %v299_v32 = vmax.f32 %v245_v31, %v296_v30  ;;  %v297_v42 = vsub.f32 %v254_v19, %v296_v30 }
 0x49a   :  { %v300_v33 = vsub.f32 %v245_v31, %v299_v32  ;;  %v303_v34 = vsub.f32 %v296_v30, %v299_v32  ;;  %v298_v46 = vadd.f32 %v297_v42, %v284_v44 }
 0x49c   :  { %v301_v35 = vmul.f32 1.442695, %v300_v33  ;;  %v304_v36 = vmul.f32 1.442695, %v303_v34 }
 0x49e   :  { %386 = vpow2.f32 %v301_v35 }
 0x49f   :  { %388 = vpow2.f32 %v304_v36 }
 0x4ab   :  { %v387_v37 = vpop.eup %386 }
 0x4ac   :  { %v389_v38 = vpop.eup %388 }
 0x4ad   :  { %v306_v39 = vadd.f32 %v389_v38, %v387_v37 }
 0x4af   :  { %390 = vlog2.f32 %v306_v39 }
 0x4bc   :  { %v391_v40 = vpop.eup %390 }
 0x4bd   :  { %v308_v41 = vmul.f32 0.6931472, %v391_v40 }
 0x4bf   :  { %v309_v43 = vadd.f32 %v308_v41, %v299_v32 }
 0x4c1   :  { %v310_v45 = vsub.f32 %v245_v31, %v309_v43 }
 0x4c3   :  { %v311_v47 = vadd.f32 %v310_v45, %v298_v46 }
 0x4c5   :  { %v312_v48 = vsub.f32 0.0, %v311_v47 }
 0x4c7   :  { %v314_v49 = vsel %vm313_vm12, %v312_v48, 0.0 }
 0x4c8   :  { %315 = vadd.xlane.f32.xlu0 %v314_v49 }
 0x551   :  { %v316_v50 = vpop.xlane.xlu0 %315 }
 0x552   :  { %v317_v51 = vrot.slane %v316_v50, 4 }
 0x554   :  { %v318_v52 = vadd.f32 %v317_v51, %v316_v50 }
 0x556   :  { %v319_v53 = vrot.slane %v318_v52, 2 }
 0x558   :  { %v320_v54 = vadd.f32 %v319_v53, %v318_v52 }
 0x55a   :  { %v321_v55 = vrot.slane %v320_v54, 1 }
 0x55c   :  { %v322_v56 = vadd.f32 %v321_v55, %v320_v54 }
 0x55e   :  { %363 = vpush %v322_v56 }
 0x58f   :  { %s364_s19 = spop %363 }
 0x590   :  { %v324_v57 = vstv %s364_s19 }
 0x591   :  { %v326_v58 = vmul.f32 0.125, %v324_v57 }
 0x593   :  { %328 = vst.msk [vmem:[#allocation7] sm:$0x1] %vm327_vm13, %v326_v58 }
 0x594   :  { %443 = shalt.err (!%p440_p0)
}
 0x595   :  { %338 = dma.vmem_to_hbm [thread:$0]  %s336_s1, 16, %s506_s2, [#allocation4]  }
 0x596   :  { %456 = dma.done.wait [#allocation4], 16  }
 0x597   :  { %457 = vsyncadd [#allocation4], 4294967280 }
 0x598   :  { %342 = vsyncpa [#allocation3], 1 }
 0x599   :  { %343 = vsyncpa [#allocation6], 1 }
 0x59a   :  { %344 = vsyncpa [#allocation4], 1 }

</bundles_post_ra>
